<compile_context>
chip_gen: v7x
topology: tpu7x:2x2x1
jax: 0.10.0
libtpu: 0.0.40
codegen_flags: <defaults>
</compile_context>

<pallas_src>
import functools

import jax
import jax.numpy as jnp
from jax.experimental import pallas as pl
from jax.experimental.pallas import tpu as pltpu

_EPS = 1e-6        # matches utils.basic.reduce_masked_mean EPS
_LANE = 128
_SUBLANE = 8


def _chip_defaults():
    """Return (block_rows, reduction_parts) tuned per TPU generation."""
    kind = ""
    try:
        kind = jax.devices()[0].device_kind.lower()
    except Exception:
        pass
    if "v7" in kind:
        # TODO(synk): verify in a trace that the leading "parallel" axis shards across
        # both v7x TensorCores; if one TC idles, switch it to pltpu.CORE_PARALLEL.
        return 8192, 2     # 4 MiB/input block; 24 MiB double-buffered, fits 32 MiB scope
    if "v6" in kind:
        return 8192, 1
    if "v5" in kind and ("lite" in kind or "5e" in kind):
        return 2048, 1     # v5e: 16 MiB default scoped VMEM -> keep blocks modest
    return 4096, 1         # unknown chip: conservative middle ground


def _bce_with_logits(x, y, pos_weight):
    # Numerically stable BCE-with-logits with pos_weight (PyTorch's formulation):
    #   log_weight = 1 + (pos_weight - 1) * y
    #   loss = (1 - y) * x + log_weight * (log1p(exp(-|x|)) + max(-x, 0))
    log_w = 1.0 + (pos_weight - 1.0) * y
    return (1.0 - y) * x + log_w * (jnp.log1p(jnp.exp(-jnp.abs(x))) +
                                    jnp.maximum(-x, 0.0))


def _simple_loss_kernel(yp_ref, yt_ref, v_ref, num_ref, den_ref, *,
                        pos_weight, block_rows, rows, steps_per_part, needs_mask):
    p = pl.program_id(0)   # part (parallel axis; sharded across cores when available)
    j = pl.program_id(1)   # streaming step within the part (reduction axis)

    @pl.when(j == 0)
    def _():
        num_ref[...] = jnp.zeros_like(num_ref)
        den_ref[...] = jnp.zeros_like(den_ref)

    x = yp_ref[...].astype(jnp.float32)
    y = yt_ref[...].astype(jnp.float32)
    v = v_ref[...].astype(jnp.float32)

    lv = _bce_with_logits(x, y, pos_weight) * v

    def accumulate(lv_blk, v_blk):
        # (block_rows,128) -> (block_rows//8, 8, 128) is the natural vreg tiling, so the
        # reshape is free and the axis-0 sum is pure VPU vreg adds (no XLU sublane reduce).
        num_ref[...] += lv_blk.reshape(-1, _SUBLANE, _LANE).sum(axis=0)[None]
        den_ref[...] += v_blk.reshape(-1, _SUBLANE, _LANE).sum(axis=0)[None]

    if not needs_mask:
        accumulate(lv, v)
    else:
        row0 = (p * steps_per_part + j) * block_rows
        is_partial = row0 + block_rows > rows

        @pl.when(jnp.logical_not(is_partial))
        def _():
            accumulate(lv, v)           # fast path: full blocks never pay for masking

        @pl.when(is_partial)
        def _():
            ridx = row0 + jax.lax.broadcasted_iota(jnp.int32, lv.shape, 0)
            inb = ridx < rows
            # Select (not multiply): garbage/NaN from the over-read tail cannot leak.
            accumulate(jnp.where(inb, lv, 0.0), jnp.where(inb, v, 0.0))


def simple_loss(ypred, ytgt, valid, pos_weight=1.0):
    """Masked-mean BCEWithLogits loss. Returns a scalar float32."""
    pos_weight = float(pos_weight)

    yp = jnp.reshape(ypred, (-1,))
    yt = jnp.reshape(ytgt, (-1,))
    vv = jnp.reshape(valid, (-1,))
    n = yp.shape[0]
    if n == 0:
        return jnp.float32(0.0)

    # Pad the flat stream to a multiple of 8*128 so the (rows, 128) reshape is free
    # (no ragged slice copies) and every block's sublane dim is aligned. Padded
    # elements contribute nothing because `valid` is padded with zeros.
    chunk = _SUBLANE * _LANE
    if n % chunk != 0:
        pad = chunk - n % chunk
        yp = jnp.pad(yp, (0, pad))
        yt = jnp.pad(yt, (0, pad))
        vv = jnp.pad(vv, (0, pad))
    rows = yp.shape[0] // _LANE

    # Keep the incoming dtype end-to-end; the kernel casts to f32 once in VMEM.
    yp2 = jnp.reshape(yp, (rows, _LANE))
    yt2 = jnp.reshape(yt, (rows, _LANE))
    vv2 = jnp.reshape(vv, (rows, _LANE))

    max_block_rows, max_parts = _chip_defaults()
    block_rows = min(max_block_rows, rows)        # rows is a multiple of 8
    nblocks = -(-rows // block_rows)
    parts = max_parts if nblocks >= max_parts else 1
    steps = -(-nblocks // parts)
    clamp = (parts * steps != nblocks)
    needs_mask = (parts * steps * block_rows != rows)

    def row_block(p, j):
        b = p * steps + j
        if clamp:
            # Over-provisioned (p, j) pairs re-read the last real block; their
            # contribution is zeroed by the in-kernel row mask.
            b = jnp.minimum(b, nblocks - 1)
        return (b, 0)

    in_blk = pl.BlockSpec((block_rows, _LANE), row_block)
    out_blk = pl.BlockSpec((1, _SUBLANE, _LANE), lambda p, j: (p, 0, 0))

    kern = functools.partial(
        _simple_loss_kernel, pos_weight=pos_weight, block_rows=block_rows,
        rows=rows, steps_per_part=steps, needs_mask=needs_mask)

    in_bytes = sum(int(a.size) * a.dtype.itemsize for a in (yp2, yt2, vv2))
    out_bytes = 2 * parts * _SUBLANE * _LANE * 4
    blk_bytes = sum(block_rows * _LANE * a.dtype.itemsize for a in (yp2, yt2, vv2))
    # 3 inputs x 2 pipeline buffers + headroom; clamped to stay well under v7x's 64 MiB.
    vmem_limit = int(min(56 << 20, max(16 << 20, 2 * blk_bytes + (8 << 20))))

    num_p, den_p = pl.pallas_call(
        kern,
        out_shape=(jax.ShapeDtypeStruct((parts, _SUBLANE, _LANE), jnp.float32),
                   jax.ShapeDtypeStruct((parts, _SUBLANE, _LANE), jnp.float32)),
        grid_spec=pltpu.PrefetchScalarGridSpec(
            num_scalar_prefetch=0,
            grid=(parts, steps),
            in_specs=[in_blk, in_blk, in_blk],
            out_specs=[out_blk, out_blk],
        ),
        compiler_params=pltpu.CompilerParams(
            dimension_semantics=("parallel", "arbitrary"),
            vmem_limit_bytes=vmem_limit),
        cost_estimate=pl.CostEstimate(
            flops=12 * rows * _LANE,
            transcendentals=2 * rows * _LANE,
            bytes_accessed=in_bytes + out_bytes),
    )(yp2, yt2, vv2)

    num = jnp.sum(num_p)
    den = jnp.sum(den_p)
    return num / (_EPS + den)


def _reference(ypred, ytgt, valid, pos_weight):
    x = ypred.astype(jnp.float32)
    y = ytgt.astype(jnp.float32)
    v = valid.astype(jnp.float32)
    loss = _bce_with_logits(x, y, pos_weight)
    return jnp.sum(loss * v) / (_EPS + jnp.sum(v))


if __name__ == "__main__":
    key = jax.random.PRNGKey(0)
    k1, k2, k3 = jax.random.split(key, 3)

    B, C, H, W = 2, 4, 16, 16
    pos_weight = 2.13  # deterministic "checkpoint" value for the module's init arg

    ypred = jax.random.normal(k1, (B, C, H, W), dtype=jnp.float32)
    ytgt = (jax.random.uniform(k2, (B, C, H, W)) > 0.5).astype(jnp.float32)
    valid = (jax.random.uniform(k3, (B, C, H, W)) > 0.3).astype(jnp.float32)

    out = simple_loss(ypred, ytgt, valid, pos_weight)
    out = jax.block_until_ready(out)

    ref = _reference(ypred, ytgt, valid, pos_weight)
    assert jnp.allclose(out, ref, rtol=1e-5, atol=1e-5), (out, ref)

    print("KERNEL_OK")
</pallas_src>

<mosaic_0001>
module attributes {stable_mosaic.version = 11 : i64} {
  func.func @_simple_loss_kernel(%arg0: i32, %arg1: i32, %arg2: memref<16x128xf32, #tpu.memory_space<vmem>>, %arg3: memref<16x128xf32, #tpu.memory_space<vmem>>, %arg4: memref<16x128xf32, #tpu.memory_space<vmem>>, %arg5: memref<1x8x128xf32, #tpu.memory_space<vmem>>, %arg6: memref<1x8x128xf32, #tpu.memory_space<vmem>>) attributes {dimension_semantics = [#tpu.dimension_semantics<parallel>, #tpu.dimension_semantics<arbitrary>], iteration_bounds = array<i64: 1, 1>, scalar_prefetch = 0 : i64, scratch_operands = 0 : i64, tpu.core_type = #tpu.core_type<tc>, window_params = [{transform_indices = @transform_0, window_bounds = array<i64: 16, 128>}, {transform_indices = @transform_1, window_bounds = array<i64: 16, 128>}, {transform_indices = @transform_2, window_bounds = array<i64: 16, 128>}, {transform_indices = @transform_3, window_bounds = array<i64: 1, 8, 128>}, {transform_indices = @transform_4, window_bounds = array<i64: 1, 8, 128>}]} {
    %c0_i32 = arith.constant 0 : i32
    %0 = arith.cmpi eq, %arg1, %c0_i32 : i32
    %1 = arith.extui %0 : i1 to i32
    %c0_i32_0 = arith.constant 0 : i32
    %2 = arith.cmpi ne, %1, %c0_i32_0 : i32
    scf.if %2 {
      %cst_25 = arith.constant 0.000000e+00 : f32
      %38 = vector.broadcast %cst_25 : f32 to vector<1x8x128xf32>
      %c0_26 = arith.constant 0 : index
      %c0_27 = arith.constant 0 : index
      %c0_28 = arith.constant 0 : index
      %39 = vector.load %arg5[%c0_26, %c0_27, %c0_28] : memref<1x8x128xf32, #tpu.memory_space<vmem>>, vector<1x8x128xf32>
      tpu.vector_store %arg5[%c0_26, %c0_27, %c0_28], %38 {strides = array<i32>} : memref<1x8x128xf32, #tpu.memory_space<vmem>>, vector<1x8x128xf32>,
      %cst_29 = arith.constant 0.000000e+00 : f32
      %40 = vector.broadcast %cst_29 : f32 to vector<1x8x128xf32>
      %c0_30 = arith.constant 0 : index
      %c0_31 = arith.constant 0 : index
      %c0_32 = arith.constant 0 : index
      %41 = vector.load %arg6[%c0_30, %c0_31, %c0_32] : memref<1x8x128xf32, #tpu.memory_space<vmem>>, vector<1x8x128xf32>
      tpu.vector_store %arg6[%c0_30, %c0_31, %c0_32], %40 {strides = array<i32>} : memref<1x8x128xf32, #tpu.memory_space<vmem>>, vector<1x8x128xf32>,
    } else {
    }
    %c0 = arith.constant 0 : index
    %c0_1 = arith.constant 0 : index
    %3 = vector.load %arg2[%c0, %c0_1] : memref<16x128xf32, #tpu.memory_space<vmem>>, vector<16x128xf32>
    %c0_2 = arith.constant 0 : index
    %c0_3 = arith.constant 0 : index
    %4 = vector.load %arg3[%c0_2, %c0_3] : memref<16x128xf32, #tpu.memory_space<vmem>>, vector<16x128xf32>
    %c0_4 = arith.constant 0 : index
    %c0_5 = arith.constant 0 : index
    %5 = vector.load %arg4[%c0_4, %c0_5] : memref<16x128xf32, #tpu.memory_space<vmem>>, vector<16x128xf32>
    %cst = arith.constant 1.130000e+00 : f32
    %6 = vector.broadcast %cst : f32 to vector<16x128xf32>
    %7 = arith.mulf %6, %4 : vector<16x128xf32>
    %cst_6 = arith.constant 1.000000e+00 : f32
    %8 = vector.broadcast %cst_6 : f32 to vector<16x128xf32>
    %9 = arith.addf %8, %7 : vector<16x128xf32>
    %cst_7 = arith.constant 1.000000e+00 : f32
    %10 = vector.broadcast %cst_7 : f32 to vector<16x128xf32>
    %11 = arith.subf %10, %4 : vector<16x128xf32>
    %12 = arith.mulf %11, %3 : vector<16x128xf32>
    %13 = math.absf %3 : vector<16x128xf32>
    %cst_8 = arith.constant 0.000000e+00 : f32
    %14 = vector.broadcast %cst_8 : f32 to vector<16x128xf32>
    %15 = arith.subf %14, %13 : vector<16x128xf32>
    %16 = math.exp %15 : vector<16x128xf32>
    %17 = math.log1p %16 : vector<16x128xf32>
    %cst_9 = arith.constant 0.000000e+00 : f32
    %18 = vector.broadcast %cst_9 : f32 to vector<16x128xf32>
    %19 = arith.subf %18, %3 : vector<16x128xf32>
    %cst_10 = arith.constant 0.000000e+00 : f32
    %20 = vector.broadcast %cst_10 : f32 to vector<16x128xf32>
    %21 = arith.maximumf %19, %20 : vector<16x128xf32>
    %22 = arith.addf %17, %21 : vector<16x128xf32>
    %23 = arith.mulf %9, %22 : vector<16x128xf32>
    %24 = arith.addf %12, %23 : vector<16x128xf32>
    %25 = arith.mulf %24, %5 : vector<16x128xf32>
    %c0_11 = arith.constant 0 : index
    %c0_12 = arith.constant 0 : index
    %c0_13 = arith.constant 0 : index
    %26 = vector.load %arg5[%c0_11, %c0_12, %c0_13] : memref<1x8x128xf32, #tpu.memory_space<vmem>>, vector<1x8x128xf32>
    %27 = vector.shape_cast %25 : vector<16x128xf32> to vector<2x8x128xf32>
    %cst_14 = arith.constant dense<0.000000e+00> : vector<8x128xf32>
    %28 = vector.multi_reduction <add>, %27, %cst_14 [0] : vector<2x8x128xf32> to vector<8x128xf32>
    %29 = vector.shape_cast %28 : vector<8x128xf32> to vector<1x8x128xf32>
    %30 = arith.addf %26, %29 : vector<1x8x128xf32>
    %c0_15 = arith.constant 0 : index
    %c0_16 = arith.constant 0 : index
    %c0_17 = arith.constant 0 : index
    %31 = vector.load %arg5[%c0_15, %c0_16, %c0_17] : memref<1x8x128xf32, #tpu.memory_space<vmem>>, vector<1x8x128xf32>
    tpu.vector_store %arg5[%c0_15, %c0_16, %c0_17], %30 {strides = array<i32>} : memref<1x8x128xf32, #tpu.memory_space<vmem>>, vector<1x8x128xf32>,
    %c0_18 = arith.constant 0 : index
    %c0_19 = arith.constant 0 : index
    %c0_20 = arith.constant 0 : index
    %32 = vector.load %arg6[%c0_18, %c0_19, %c0_20] : memref<1x8x128xf32, #tpu.memory_space<vmem>>, vector<1x8x128xf32>
    %33 = vector.shape_cast %5 : vector<16x128xf32> to vector<2x8x128xf32>
    %cst_21 = arith.constant dense<0.000000e+00> : vector<8x128xf32>
    %34 = vector.multi_reduction <add>, %33, %cst_21 [0] : vector<2x8x128xf32> to vector<8x128xf32>
    %35 = vector.shape_cast %34 : vector<8x128xf32> to vector<1x8x128xf32>
    %36 = arith.addf %32, %35 : vector<1x8x128xf32>
    %c0_22 = arith.constant 0 : index
    %c0_23 = arith.constant 0 : index
    %c0_24 = arith.constant 0 : index
    %37 = vector.load %arg6[%c0_22, %c0_23, %c0_24] : memref<1x8x128xf32, #tpu.memory_space<vmem>>, vector<1x8x128xf32>
    tpu.vector_store %arg6[%c0_22, %c0_23, %c0_24], %36 {strides = array<i32>} : memref<1x8x128xf32, #tpu.memory_space<vmem>>, vector<1x8x128xf32>,
    return
  }
  func.func @transform_0(%arg0: i32, %arg1: i32) -> (i32, i32) {
    %c1_i32 = arith.constant 1 : i32
    %0 = arith.muli %arg0, %c1_i32 : i32
    %1 = arith.addi %0, %arg1 : i32
    %c0_i32 = arith.constant 0 : i32
    %c0_i32_0 = arith.constant 0 : i32
    return %1, %c0_i32 : i32, i32
  }
  func.func @transform_1(%arg0: i32, %arg1: i32) -> (i32, i32) {
    %c1_i32 = arith.constant 1 : i32
    %0 = arith.muli %arg0, %c1_i32 : i32
    %1 = arith.addi %0, %arg1 : i32
    %c0_i32 = arith.constant 0 : i32
    %c0_i32_0 = arith.constant 0 : i32
    return %1, %c0_i32 : i32, i32
  }
  func.func @transform_2(%arg0: i32, %arg1: i32) -> (i32, i32) {
    %c1_i32 = arith.constant 1 : i32
    %0 = arith.muli %arg0, %c1_i32 : i32
    %1 = arith.addi %0, %arg1 : i32
    %c0_i32 = arith.constant 0 : i32
    %c0_i32_0 = arith.constant 0 : i32
    return %1, %c0_i32 : i32, i32
  }
  func.func @transform_3(%arg0: i32, %arg1: i32) -> (i32, i32, i32) {
    %c0_i32 = arith.constant 0 : i32
    %c0_i32_0 = arith.constant 0 : i32
    %c0_i32_1 = arith.constant 0 : i32
    return %arg0, %c0_i32, %c0_i32_0 : i32, i32, i32
  }
  func.func @transform_4(%arg0: i32, %arg1: i32) -> (i32, i32, i32) {
    %c0_i32 = arith.constant 0 : i32
    %c0_i32_0 = arith.constant 0 : i32
    %c0_i32_1 = arith.constant 0 : i32
    return %arg0, %c0_i32, %c0_i32_0 : i32, i32, i32
  }
}

</mosaic_0001>

<bundles_post_ra>
// kernel: tpu_custom_call.1
= control target key start
LH: loop header
LB: loop body
LE: loop exit
PB: predicated region body
PF: predicated region fallthrough
CT: control target
= control target key end

     0   :  { %10 = vsyncpa [#allocation3], 0  ;;  %s433_s0 = inlined_call_operand.hbm [shape: f32[16,128], index: 0, kind: input, shape index: {}]   ;;  %s434_s1 = inlined_call_operand.hbm [shape: f32[16,128], index: 1, kind: input, shape index: {}]   ;;  %s435_s2 = inlined_call_operand.hbm [shape: f32[16,128], index: 2, kind: input, shape index: {}]   ;;  %s436_s3 = inlined_call_operand.hbm [shape: f32[1,8,128], index: 3, kind: output, shape index: {0}]   ;;  %s437_s4 = inlined_call_operand.hbm [shape: f32[1,8,128], index: 4, kind: output, shape index: {1}]  }
   0x1   :  { %11 = vsyncpa [#allocation6], 0 }
   0x2   :  { %12 = vsyncpa [#allocation4], 0 }
   0x3   :  { %13 = vsyncpa [#allocation10], 0  ;;  %s307_s15 = smov [#allocation5]   ;;  %s308_s17 = smov [#allocation2]  }
   0x4   :  { %s39_s16 = sshll.u32 %s307_s15, 4  ;;  %s23_s18 = sshll.u32 %s308_s17, 4  ;;  %s40_s16 = int_to_ptr.vmem [resolvable:$true] %s39_s16  ;;  %s339_s18 = int_to_ptr.vmem [resolvable:$true] %s23_s18 }
   0x5   :  { %s189_s21 = scalar_lea.hbm %s434_s1, 256 }
   0x6   :  { %p190_p0 = scmp.ne.s32.totalorder %s434_s1, %s189_s21  ;;  %p193_p1 = scmp.lt.u32.totalorder %s189_s21, %s434_s1 }
   0x8   :  { %p195_p2 = pnand %p193_p1, %p190_p0 }
   0xa   :  { %198 = shalt.err (!%p195_p2)
}
   0xb   :  { %s199_s26 = scalar_lea.vmem %s40_s16, 256  ;;  %p204_p4 = scmp.lt.s32.totalorder %s40_s16, %s40_s16 }
   0xc   :  { %p200_p3 = scmp.ne.s32.totalorder %s40_s16, %s199_s26  ;;  %p205_p5 = scmp.lt.s32.totalorder %s199_s26, %s199_s26 }
   0xe   :  { %p206_p6 = por %p205_p5, %p204_p4 }
  0x10   :  { %p207_p7 = pnand %p206_p6, %p200_p3 }
  0x12   :  { %210 = shalt.err (!%p207_p7)
}
  0x13   :  { %s309_s27 = smov 128   ;;  %s310_s28 = smov 8  }
  0x14   :  { %45 = dma.hbm_to_vmem [thread:$0]  %s434_s1, 256, %s40_s16, [#allocation6], %s309_s27, %s309_s27, %s310_s28  }
  0x15   :  { %s211_s7 = scalar_lea.hbm %s433_s0, 256 }
  0x16   :  { %p212_p8 = scmp.ne.s32.totalorder %s433_s0, %s211_s7  ;;  %p215_p9 = scmp.lt.u32.totalorder %s211_s7, %s433_s0 }
  0x18   :  { %p217_p10 = pnand %p215_p9, %p212_p8 }
  0x1a   :  { %220 = shalt.err (!%p217_p10)
}
  0x1b   :  { %s221_s12 = scalar_lea.vmem %s339_s18, 256  ;;  %p226_p12 = scmp.lt.s32.totalorder %s339_s18, %s339_s18 }
  0x1c   :  { %p222_p11 = scmp.ne.s32.totalorder %s339_s18, %s221_s12  ;;  %p227_p13 = scmp.lt.s32.totalorder %s221_s12, %s221_s12 }
  0x1e   :  { %p228_p0 = por %p227_p13, %p226_p12 }
  0x20   :  { %p229_p1 = pnand %p228_p0, %p222_p11 }
  0x22   :  { %232 = shalt.err (!%p229_p1)
}
  0x23   :  { %29 = dma.hbm_to_vmem [thread:$0]  %s433_s0, 256, %s339_s18, [#allocation3], %s309_s27, %s309_s27, %s310_s28  }
  0x24   :  { %s311_s14 = smov [#allocation7]   ;;  %s233_s19 = scalar_lea.hbm %s435_s2, 256 }
  0x25   :  { %s55_s15 = sshll.u32 %s311_s14, 4  ;;  %p234_p2 = scmp.ne.s32.totalorder %s435_s2, %s233_s19  ;;  %s56_s15 = int_to_ptr.vmem [resolvable:$true] %s55_s15 }
  0x26   :  { %p237_p3 = scmp.lt.u32.totalorder %s233_s19, %s435_s2 }
  0x28   :  { %p239_p4 = pnand %p237_p3, %p234_p2 }
  0x2a   :  { %242 = shalt.err (!%p239_p4)
}
  0x2b   :  { %s243_s24 = scalar_lea.vmem %s56_s15, 256  ;;  %p248_p6 = scmp.lt.s32.totalorder %s56_s15, %s56_s15 }
  0x2c   :  { %p244_p5 = scmp.ne.s32.totalorder %s56_s15, %s243_s24  ;;  %p249_p7 = scmp.lt.s32.totalorder %s243_s24, %s243_s24 }
  0x2e   :  { %p250_p8 = por %p249_p7, %p248_p6 }
  0x30   :  { %p251_p9 = pnand %p250_p8, %p244_p5 }
  0x32   :  { %254 = shalt.err (!%p251_p9)
}
  0x33   :  { %61 = dma.hbm_to_vmem [thread:$0]  %s435_s2, 256, %s56_s15, [#allocation6], %s309_s27, %s309_s27, %s310_s28  }
  0x34   :  { %299 = dma.done.wait [#allocation3], 256  }
  0x35   :  { %300 = vsyncadd [#allocation3], 4294967040 }
  0x36   :  { %301 = dma.done.wait [#allocation6], 512  }
  0x37   :  { %302 = vsyncadd [#allocation6], 4294966784  ;;  %v391_v0 = vld [vmem:[#allocation2] sm:$0xff]  ;;  %v393_v1 = vld [vmem:[#allocation2 + $0x8] sm:$0xff]  ;;  %s312_s25 = smov [#allocation9]  }
  0x38   :  { %v97_v2 = vand.u32 2147483647, %v391_v0  ;;  %v98_v3 = vand.u32 2147483647, %v393_v1  ;;  %v397_v4 = vld [vmem:[#allocation7] sm:$0xff]  ;;  %v399_v5 = vld [vmem:[#allocation7 + $0x8] sm:$0xff] }
  0x39   :  { %s159_s26 = sshll.u32 %s312_s25, 4  ;;  %v140_v8 = vadd.f32 %v399_v5, %v397_v4  ;;  %s160_s26 = int_to_ptr.vmem [resolvable:$true] %s159_s26 }
  0x3a   :  { %v99_v6 = vsub.f32 0.0, %v97_v2  ;;  %v100_v7 = vsub.f32 0.0, %v98_v3  ;;  %s255_s2 = scalar_lea.vmem %s160_s26, 128  ;;  %p260_p11 = scmp.lt.s32.totalorder %s160_s26, %s160_s26 }
  0x3b   :  { %142 = vst [vmem:[#allocation9] sm:$0xff] %v140_v8  ;;  %p256_p10 = scmp.ne.s32.totalorder %s160_s26, %s255_s2  ;;  %p261_p12 = scmp.lt.s32.totalorder %s255_s2, %s255_s2 }
  0x3c   :  { %v101_v9 = vmul.f32 1.442695, %v99_v6  ;;  %v103_v10 = vmul.f32 1.442695, %v100_v7 }
  0x3d   :  { %p262_p13 = por %p261_p12, %p260_p11 }
  0x3e   :  { %181 = vpow2.f32 %v101_v9 }
  0x3f   :  { %183 = vpow2.f32 %v103_v10  ;;  %p263_p0 = pnand %p262_p13, %p256_p10 }
  0x41   :  { %266 = shalt.err (!%p263_p0)
}
  0x42   :  { %s267_s29 = scalar_lea.hbm %s437_s4, 128 }
  0x43   :  { %p268_p1 = scmp.ne.s32.totalorder %s437_s4, %s267_s29  ;;  %p271_p2 = scmp.lt.u32.totalorder %s267_s29, %s437_s4 }
  0x45   :  { %p273_p3 = pnand %p271_p2, %p268_p1 }
  0x47   :  { %276 = shalt.err (!%p273_p3)
}
  0x48   :  { %162 = dma.vmem_to_hbm [thread:$0]  %s160_s26, 128, %s437_s4, [#allocation10]   ;;  %v182_v11 = vpop.eup %181  ;;  %v85_v17 = vld [vmem:[#allocation5] sm:$0xff]  ;;  %v86_v19 = vld [vmem:[#allocation5 + $0x8] sm:$0xff]  ;;  %v123_v22 = vsub.f32 0.0, %v391_v0  ;;  %v124_v24 = vsub.f32 0.0, %v393_v1 }
  0x49   :  { %v184_v12 = vpop.eup %183  ;;  %v105_v13 = vadd.f32 1.0, %v182_v11  ;;  %v108_v15 = vmul.f32 -0.5, %v182_v11  ;;  %v111_v20 = vand.u32 2147483647, %v182_v11  ;;  %v89_v25 = vmul.f32 1.13, %v85_v17 }
  0x4a   :  { %v114_v14 = vadd.f32 1.0, %v184_v12  ;;  %v117_v16 = vmul.f32 -0.5, %v184_v12  ;;  %v120_v23 = vand.u32 2147483647, %v184_v12  ;;  %v90_v26 = vmul.f32 1.13, %v86_v19 }
  0x4b   :  { %185 = vlog2.f32 %v105_v13  ;;  %v109_v18 = vadd.f32 1.0, %v108_v15  ;;  %v93_v29 = vsub.f32 1.0, %v85_v17  ;;  %vm112_vm0 = vcmp.lt.f32.partialorder %v111_v20, 0.0004427343  ;;  %s313_s4 = smov [#allocation8]  }
  0x4c   :  { %187 = vlog2.f32 %v114_v14  ;;  %v118_v21 = vadd.f32 1.0, %v117_v16  ;;  %v125_v31 = vmax.f32 %v123_v22, 0.0  ;;  %v94_v33 = vsub.f32 1.0, %v86_v19  ;;  %s149_s10 = sshll.u32 %s313_s4, 4  ;;  %s150_s10 = int_to_ptr.vmem [resolvable:$true] %s149_s10 }
  0x4d   :  { %v110_v27 = vmul.f32 %v182_v11, %v109_v18  ;;  %vm121_vm1 = vcmp.lt.f32.partialorder %v120_v23, 0.0004427343  ;;  %v126_v35 = vmax.f32 %v124_v24, 0.0  ;;  %v91_v36 = vadd.f32 1.0, %v89_v25  ;;  %s277_s11 = scalar_lea.vmem %s150_s10, 128  ;;  %p282_p5 = scmp.lt.s32.totalorder %s150_s10, %s150_s10 }
  0x4e   :  { %v119_v30 = vmul.f32 %v184_v12, %v118_v21  ;;  %v92_v38 = vadd.f32 1.0, %v90_v26  ;;  %v95_v40 = vmul.f32 %v93_v29, %v391_v0  ;;  %v96_v43 = vmul.f32 %v94_v33, %v393_v1  ;;  %p278_p4 = scmp.ne.s32.totalorder %s150_s10, %s277_s11  ;;  %p283_p6 = scmp.lt.s32.totalorder %s277_s11, %s277_s11 }
  0x50   :  { %p284_p7 = por %p283_p6, %p282_p5 }
  0x52   :  { %p285_p8 = pnand %p284_p7, %p278_p4 }
  0x55   :  { %v186_v28 = vpop.eup %185 }
  0x56   :  { %v188_v32 = vpop.eup %187  ;;  %v107_v34 = vmul.f32 0.6931472, %v186_v28 }
  0x57   :  { %v116_v37 = vmul.f32 0.6931472, %v188_v32 }
  0x58   :  { %v113_v39 = vsel %vm112_vm0, %v110_v27, %v107_v34 }
  0x59   :  { %v122_v41 = vsel %vm121_vm1, %v119_v30, %v116_v37  ;;  %v127_v42 = vadd.f32 %v125_v31, %v113_v39 }
  0x5a   :  { %v128_v44 = vadd.f32 %v126_v35, %v122_v41 }
  0x5b   :  { %v129_v45 = vmul.f32 %v127_v42, %v91_v36 }
  0x5c   :  { %v130_v46 = vmul.f32 %v128_v44, %v92_v38 }
  0x5d   :  { %v131_v47 = vadd.f32 %v129_v45, %v95_v40 }
  0x5e   :  { %v132_v48 = vadd.f32 %v130_v46, %v96_v43 }
  0x5f   :  { %v133_v49 = vmul.f32 %v131_v47, %v397_v4 }
  0x60   :  { %v134_v50 = vmul.f32 %v132_v48, %v399_v5 }
  0x62   :  { %v136_v51 = vadd.f32 %v134_v50, %v133_v49 }
  0x64   :  { %138 = vst [vmem:[#allocation8] sm:$0xff] %v136_v51 }
  0x65   :  { %288 = shalt.err (!%p285_p8)
}
  0x66   :  { %s289_s13 = scalar_lea.hbm %s436_s3, 128 }
  0x67   :  { %p290_p9 = scmp.ne.s32.totalorder %s436_s3, %s289_s13  ;;  %p293_p10 = scmp.lt.u32.totalorder %s289_s13, %s436_s3 }
  0x69   :  { %p295_p11 = pnand %p293_p10, %p290_p9 }
  0x6b   :  { %298 = shalt.err (!%p295_p11)
}
  0x6c   :  { %152 = dma.vmem_to_hbm [thread:$0]  %s150_s10, 128, %s436_s3, [#allocation4]  }
  0x6d   :  { %303 = dma.done.wait [#allocation4], 128  }
  0x6e   :  { %304 = vsyncadd [#allocation4], 4294967168 }
  0x6f   :  { %305 = dma.done.wait [#allocation10], 128  }
  0x70   :  { %306 = vsyncadd [#allocation10], 4294967168 }
  0x71   :  { %169 = vsyncpa [#allocation3], 1 }
  0x72   :  { %170 = vsyncpa [#allocation6], 1 }
  0x73   :  { %171 = vsyncpa [#allocation4], 1 }
  0x74   :  { %172 = vsyncpa [#allocation10], 1 }

</bundles_post_ra>
